<compile_context>
chip_gen: v6e
topology: v6e:2x2x1
jax: 0.10.0
libtpu: 0.0.40
codegen_flags: <defaults>
</compile_context>

<pallas_src>
import functools
import math

import numpy as np
import jax
import jax.numpy as jnp
from jax import lax
from jax.experimental import pallas as pl
from jax.experimental.pallas import tpu as pltpu


def _encoder_block_kernel(
    query_ref, key_ref, value_ref, pos_q_ref, pos_k_ref,
    wq_ref, bq_ref, wk_ref, bk_ref, wv_ref, bv_ref,
    wo_ref, bo_ref,
    ln1_g_ref, ln1_b_ref,
    w1_ref, b1_ref, w2_ref, b2_ref,
    ln2_g_ref, ln2_b_ref,
    o_ref,
    *, heads):
    L, E = query_ref.shape[1], query_ref.shape[2]
    dh = E // heads
    scale = jnp.float32(1.0 / math.sqrt(dh))
    eps = jnp.float32(1e-5)

    # --- input projections (q/k get positional encodings added first) ---
    q_in = query_ref[0] + pos_q_ref[0]          # (L, E)
    k_in = key_ref[0] + pos_k_ref[0]
    v_in = value_ref[0]

    q = jnp.dot(q_in, wq_ref[...], preferred_element_type=jnp.float32) + bq_ref[...]
    k = jnp.dot(k_in, wk_ref[...], preferred_element_type=jnp.float32) + bk_ref[...]
    v = jnp.dot(v_in, wv_ref[...], preferred_element_type=jnp.float32) + bv_ref[...]

    # --- multi-head scaled dot-product attention (static unroll over heads) ---
    head_outs = []
    for h in range(heads):
        sl = slice(h * dh, (h + 1) * dh)
        qh, kh, vh = q[:, sl], k[:, sl], v[:, sl]          # (L, dh)
        s = jnp.dot(qh, kh.T, preferred_element_type=jnp.float32) * scale   # (L, L)
        s = s - jnp.max(s, axis=-1, keepdims=True)
        p = jnp.exp(s)
        p = p / jnp.sum(p, axis=-1, keepdims=True)
        head_outs.append(jnp.dot(p, vh, preferred_element_type=jnp.float32))
    attn = jnp.concatenate(head_outs, axis=-1)             # (L, E)
    attn_out = jnp.dot(attn, wo_ref[...], preferred_element_type=jnp.float32) + bo_ref[...]

    # --- residual + LayerNorm1 (dropout == identity in eval mode) ---
    x1 = attn_out + query_ref[0]
    mu1 = jnp.mean(x1, axis=-1, keepdims=True)
    var1 = jnp.mean(jnp.square(x1 - mu1), axis=-1, keepdims=True)
    x1n = (x1 - mu1) * lax.rsqrt(var1 + eps) * ln1_g_ref[...] + ln1_b_ref[...]

    # --- FeedForward: Linear(E,8E) -> ReLU -> Linear(8E,E) ---
    h1 = jnp.maximum(
        jnp.dot(x1n, w1_ref[...], preferred_element_type=jnp.float32) + b1_ref[...], 0.0)
    ff = jnp.dot(h1, w2_ref[...], preferred_element_type=jnp.float32) + b2_ref[...]

    # --- residual + LayerNorm2 ---
    x2 = x1n + ff
    mu2 = jnp.mean(x2, axis=-1, keepdims=True)
    var2 = jnp.mean(jnp.square(x2 - mu2), axis=-1, keepdims=True)
    o_ref[0] = (x2 - mu2) * lax.rsqrt(var2 + eps) * ln2_g_ref[...] + ln2_b_ref[...]


def transformer_encoder_block(query, key, value, pos_query, pos_key, params, heads):
    B, L, E = query.shape

    def full_spec(shape):
        nd = len(shape)
        return pl.BlockSpec(shape, lambda b, _nd=nd: (0,) * _nd)

    batched = pl.BlockSpec((1, L, E), lambda b: (b, 0, 0))

    weight_order = ["wq", "bq", "wk", "bk", "wv", "bv", "wo", "bo",
                    "ln1_g", "ln1_b", "w1", "b1", "w2", "b2", "ln2_g", "ln2_b"]
    in_specs = [batched] * 5 + [full_spec(params[name].shape) for name in weight_order]

    kernel = functools.partial(_encoder_block_kernel, heads=heads)

    return pl.pallas_call(
        kernel,
        out_shape=jax.ShapeDtypeStruct((B, L, E), jnp.float32),
        grid=(B,),
        in_specs=in_specs,
        out_specs=pl.BlockSpec((1, L, E), lambda b: (b, 0, 0)),
        compiler_params=pltpu.CompilerParams(dimension_semantics=("parallel",)),
    )(query, key, value, pos_query, pos_key,
      *[params[name] for name in weight_order])


def _init_params(key, E, hidden):
    ks = jax.random.split(key, 16)

    def rnd(k, shape, s=0.08):
        return jax.random.normal(k, shape, jnp.float32) * s

    return dict(
        wq=rnd(ks[0], (E, E)), bq=rnd(ks[1], (1, E)),
        wk=rnd(ks[2], (E, E)), bk=rnd(ks[3], (1, E)),
        wv=rnd(ks[4], (E, E)), bv=rnd(ks[5], (1, E)),
        wo=rnd(ks[6], (E, E)), bo=rnd(ks[7], (1, E)),
        ln1_g=1.0 + rnd(ks[8], (1, E), 0.05), ln1_b=rnd(ks[9], (1, E)),
        w1=rnd(ks[10], (E, hidden)), b1=rnd(ks[11], (1, hidden)),
        w2=rnd(ks[12], (hidden, E)), b2=rnd(ks[13], (1, E)),
        ln2_g=1.0 + rnd(ks[14], (1, E), 0.05), ln2_b=rnd(ks[15], (1, E)),
    )


def _reference(query, key, value, pos_q, pos_k, p, heads):
    """Numpy transcription of the PyTorch forward (eval mode) for verification."""
    def ln(x, g, b, eps=1e-5):
        mu = x.mean(-1, keepdims=True)
        var = ((x - mu) ** 2).mean(-1, keepdims=True)
        return (x - mu) / np.sqrt(var + eps) * g + b

    B, L, E = query.shape
    dh = E // heads
    q = (query + pos_q) @ p["wq"] + p["bq"]
    k = (key + pos_k) @ p["wk"] + p["bk"]
    v = value @ p["wv"] + p["bv"]
    qh = q.reshape(B, L, heads, dh).transpose(0, 2, 1, 3)
    kh = k.reshape(B, L, heads, dh).transpose(0, 2, 1, 3)
    vh = v.reshape(B, L, heads, dh).transpose(0, 2, 1, 3)
    s = (qh @ kh.transpose(0, 1, 3, 2)) / np.sqrt(dh)
    s = s - s.max(-1, keepdims=True)
    e = np.exp(s)
    attn_w = e / e.sum(-1, keepdims=True)
    a = (attn_w @ vh).transpose(0, 2, 1, 3).reshape(B, L, E)
    attn_out = a @ p["wo"] + p["bo"]
    x1 = ln(attn_out + query, p["ln1_g"], p["ln1_b"])
    h1 = np.maximum(x1 @ p["w1"] + p["b1"], 0.0)
    ff = h1 @ p["w2"] + p["b2"]
    return ln(x1 + ff, p["ln2_g"], p["ln2_b"])


if __name__ == "__main__":
    B, L, E, heads = 2, 8, 32, 4
    hidden = 8 * E

    root = jax.random.PRNGKey(0)
    k_in, k_par = jax.random.split(root)
    kq, kk, kv, kpq, kpk = jax.random.split(k_in, 5)
    query = jax.random.normal(kq, (B, L, E), jnp.float32)
    key_ = jax.random.normal(kk, (B, L, E), jnp.float32)
    value = jax.random.normal(kv, (B, L, E), jnp.float32)
    pos_q = jax.random.normal(kpq, (B, L, E), jnp.float32)
    pos_k = jax.random.normal(kpk, (B, L, E), jnp.float32)
    params = _init_params(k_par, E, hidden)

    out = jax.block_until_ready(
        transformer_encoder_block(query, key_, value, pos_q, pos_k, params, heads))
    assert out.shape == (B, L, E) and out.dtype == jnp.float32

    ref = _reference(
        np.asarray(query), np.asarray(key_), np.asarray(value),
        np.asarray(pos_q), np.asarray(pos_k),
        {name: np.asarray(val) for name, val in params.items()}, heads)
    np.testing.assert_allclose(np.asarray(out), np.asarray(ref, np.float32),
                               atol=1e-2, rtol=1e-2)
    print("KERNEL_OK")
</pallas_src>

<mosaic_0001>
module attributes {stable_mosaic.version = 11 : i64} {
  func.func @_encoder_block_kernel(%arg0: i32, %arg1: memref<1x8x32xf32, #tpu.memory_space<vmem>>, %arg2: memref<1x8x32xf32, #tpu.memory_space<vmem>>, %arg3: memref<1x8x32xf32, #tpu.memory_space<vmem>>, %arg4: memref<1x8x32xf32, #tpu.memory_space<vmem>>, %arg5: memref<1x8x32xf32, #tpu.memory_space<vmem>>, %arg6: memref<32x32xf32, #tpu.memory_space<vmem>>, %arg7: memref<1x32xf32, #tpu.memory_space<vmem>>, %arg8: memref<32x32xf32, #tpu.memory_space<vmem>>, %arg9: memref<1x32xf32, #tpu.memory_space<vmem>>, %arg10: memref<32x32xf32, #tpu.memory_space<vmem>>, %arg11: memref<1x32xf32, #tpu.memory_space<vmem>>, %arg12: memref<32x32xf32, #tpu.memory_space<vmem>>, %arg13: memref<1x32xf32, #tpu.memory_space<vmem>>, %arg14: memref<1x32xf32, #tpu.memory_space<vmem>>, %arg15: memref<1x32xf32, #tpu.memory_space<vmem>>, %arg16: memref<32x256xf32, #tpu.memory_space<vmem>>, %arg17: memref<1x256xf32, #tpu.memory_space<vmem>>, %arg18: memref<256x32xf32, #tpu.memory_space<vmem>>, %arg19: memref<1x32xf32, #tpu.memory_space<vmem>>, %arg20: memref<1x32xf32, #tpu.memory_space<vmem>>, %arg21: memref<1x32xf32, #tpu.memory_space<vmem>>, %arg22: memref<1x8x32xf32, #tpu.memory_space<vmem>>) attributes {dimension_semantics = [#tpu.dimension_semantics<parallel>], iteration_bounds = array<i64: 2>, scalar_prefetch = 0 : i64, scratch_operands = 0 : i64, tpu.core_type = #tpu.core_type<tc>, window_params = [{transform_indices = @transform_0, window_bounds = array<i64: 1, 8, 32>}, {transform_indices = @transform_1, window_bounds = array<i64: 1, 8, 32>}, {transform_indices = @transform_2, window_bounds = array<i64: 1, 8, 32>}, {transform_indices = @transform_3, window_bounds = array<i64: 1, 8, 32>}, {transform_indices = @transform_4, window_bounds = array<i64: 1, 8, 32>}, {pipeline_mode = #tpu.pipeline_mode<synchronous>, transform_indices = @transform_5, window_bounds = array<i64: 32, 32>}, {pipeline_mode = #tpu.pipeline_mode<synchronous>, transform_indices = @transform_6, window_bounds = array<i64: 1, 32>}, {pipeline_mode = #tpu.pipeline_mode<synchronous>, transform_indices = @transform_7, window_bounds = array<i64: 32, 32>}, {pipeline_mode = #tpu.pipeline_mode<synchronous>, transform_indices = @transform_8, window_bounds = array<i64: 1, 32>}, {pipeline_mode = #tpu.pipeline_mode<synchronous>, transform_indices = @transform_9, window_bounds = array<i64: 32, 32>}, {pipeline_mode = #tpu.pipeline_mode<synchronous>, transform_indices = @transform_10, window_bounds = array<i64: 1, 32>}, {pipeline_mode = #tpu.pipeline_mode<synchronous>, transform_indices = @transform_11, window_bounds = array<i64: 32, 32>}, {pipeline_mode = #tpu.pipeline_mode<synchronous>, transform_indices = @transform_12, window_bounds = array<i64: 1, 32>}, {pipeline_mode = #tpu.pipeline_mode<synchronous>, transform_indices = @transform_13, window_bounds = array<i64: 1, 32>}, {pipeline_mode = #tpu.pipeline_mode<synchronous>, transform_indices = @transform_14, window_bounds = array<i64: 1, 32>}, {pipeline_mode = #tpu.pipeline_mode<synchronous>, transform_indices = @transform_15, window_bounds = array<i64: 32, 256>}, {pipeline_mode = #tpu.pipeline_mode<synchronous>, transform_indices = @transform_16, window_bounds = array<i64: 1, 256>}, {pipeline_mode = #tpu.pipeline_mode<synchronous>, transform_indices = @transform_17, window_bounds = array<i64: 256, 32>}, {pipeline_mode = #tpu.pipeline_mode<synchronous>, transform_indices = @transform_18, window_bounds = array<i64: 1, 32>}, {pipeline_mode = #tpu.pipeline_mode<synchronous>, transform_indices = @transform_19, window_bounds = array<i64: 1, 32>}, {pipeline_mode = #tpu.pipeline_mode<synchronous>, transform_indices = @transform_20, window_bounds = array<i64: 1, 32>}, {transform_indices = @transform_21, window_bounds = array<i64: 1, 8, 32>}]} {
    %c0 = arith.constant 0 : index
    %c0_0 = arith.constant 0 : index
    %c0_1 = arith.constant 0 : index
    %0 = vector.load %arg1[%c0, %c0_0, %c0_1] : memref<1x8x32xf32, #tpu.memory_space<vmem>>, vector<1x8x32xf32>
    %1 = vector.shape_cast %0 : vector<1x8x32xf32> to vector<8x32xf32>
    %c0_2 = arith.constant 0 : index
    %c0_3 = arith.constant 0 : index
    %c0_4 = arith.constant 0 : index
    %2 = vector.load %arg4[%c0_2, %c0_3, %c0_4] : memref<1x8x32xf32, #tpu.memory_space<vmem>>, vector<1x8x32xf32>
    %3 = vector.shape_cast %2 : vector<1x8x32xf32> to vector<8x32xf32>
    %4 = arith.addf %1, %3 : vector<8x32xf32>
    %c0_5 = arith.constant 0 : index
    %c0_6 = arith.constant 0 : index
    %c0_7 = arith.constant 0 : index
    %5 = vector.load %arg2[%c0_5, %c0_6, %c0_7] : memref<1x8x32xf32, #tpu.memory_space<vmem>>, vector<1x8x32xf32>
    %6 = vector.shape_cast %5 : vector<1x8x32xf32> to vector<8x32xf32>
    %c0_8 = arith.constant 0 : index
    %c0_9 = arith.constant 0 : index
    %c0_10 = arith.constant 0 : index
    %7 = vector.load %arg5[%c0_8, %c0_9, %c0_10] : memref<1x8x32xf32, #tpu.memory_space<vmem>>, vector<1x8x32xf32>
    %8 = vector.shape_cast %7 : vector<1x8x32xf32> to vector<8x32xf32>
    %9 = arith.addf %6, %8 : vector<8x32xf32>
    %c0_11 = arith.constant 0 : index
    %c0_12 = arith.constant 0 : index
    %c0_13 = arith.constant 0 : index
    %10 = vector.load %arg3[%c0_11, %c0_12, %c0_13] : memref<1x8x32xf32, #tpu.memory_space<vmem>>, vector<1x8x32xf32>
    %11 = vector.shape_cast %10 : vector<1x8x32xf32> to vector<8x32xf32>
    %c0_14 = arith.constant 0 : index
    %c0_15 = arith.constant 0 : index
    %12 = vector.load %arg6[%c0_14, %c0_15] : memref<32x32xf32, #tpu.memory_space<vmem>>, vector<32x32xf32>
    %cst = arith.constant dense<0.000000e+00> : vector<8x32xf32>
    %13 = tpu.matmul %4, %12, %cst {dimension_numbers = #tpu.dot_dimension_numbers<[1], [0], [0], [1], [0, 0, 1, 1], [], []>} : vector<8x32xf32>, vector<32x32xf32>, vector<8x32xf32> -> vector<8x32xf32>
    %c0_16 = arith.constant 0 : index
    %c0_17 = arith.constant 0 : index
    %14 = vector.load %arg7[%c0_16, %c0_17] : memref<1x32xf32, #tpu.memory_space<vmem>>, vector<1x32xf32>
    %15 = vector.broadcast %14 : vector<1x32xf32> to vector<8x32xf32>
    %16 = arith.addf %13, %15 : vector<8x32xf32>
    %c0_18 = arith.constant 0 : index
    %c0_19 = arith.constant 0 : index
    %17 = vector.load %arg8[%c0_18, %c0_19] : memref<32x32xf32, #tpu.memory_space<vmem>>, vector<32x32xf32>
    %cst_20 = arith.constant dense<0.000000e+00> : vector<8x32xf32>
    %18 = tpu.matmul %9, %17, %cst_20 {dimension_numbers = #tpu.dot_dimension_numbers<[1], [0], [0], [1], [0, 0, 1, 1], [], []>} : vector<8x32xf32>, vector<32x32xf32>, vector<8x32xf32> -> vector<8x32xf32>
    %c0_21 = arith.constant 0 : index
    %c0_22 = arith.constant 0 : index
    %19 = vector.load %arg9[%c0_21, %c0_22] : memref<1x32xf32, #tpu.memory_space<vmem>>, vector<1x32xf32>
    %20 = vector.broadcast %19 : vector<1x32xf32> to vector<8x32xf32>
    %21 = arith.addf %18, %20 : vector<8x32xf32>
    %c0_23 = arith.constant 0 : index
    %c0_24 = arith.constant 0 : index
    %22 = vector.load %arg10[%c0_23, %c0_24] : memref<32x32xf32, #tpu.memory_space<vmem>>, vector<32x32xf32>
    %cst_25 = arith.constant dense<0.000000e+00> : vector<8x32xf32>
    %23 = tpu.matmul %11, %22, %cst_25 {dimension_numbers = #tpu.dot_dimension_numbers<[1], [0], [0], [1], [0, 0, 1, 1], [], []>} : vector<8x32xf32>, vector<32x32xf32>, vector<8x32xf32> -> vector<8x32xf32>
    %c0_26 = arith.constant 0 : index
    %c0_27 = arith.constant 0 : index
    %24 = vector.load %arg11[%c0_26, %c0_27] : memref<1x32xf32, #tpu.memory_space<vmem>>, vector<1x32xf32>
    %25 = vector.broadcast %24 : vector<1x32xf32> to vector<8x32xf32>
    %26 = arith.addf %23, %25 : vector<8x32xf32>
    %27 = vector.extract_strided_slice %16 {offsets = [0, 0], sizes = [8, 8], strides = [1, 1]} : vector<8x32xf32> to vector<8x8xf32>
    %28 = vector.extract_strided_slice %21 {offsets = [0, 0], sizes = [8, 8], strides = [1, 1]} : vector<8x32xf32> to vector<8x8xf32>
    %29 = vector.extract_strided_slice %26 {offsets = [0, 0], sizes = [8, 8], strides = [1, 1]} : vector<8x32xf32> to vector<8x8xf32>
    %30 = tpu.transpose %28, [1, 0] : vector<8x8xf32> -> vector<8x8xf32>
    %cst_28 = arith.constant dense<0.000000e+00> : vector<8x8xf32>
    %31 = tpu.matmul %27, %30, %cst_28 {dimension_numbers = #tpu.dot_dimension_numbers<[1], [0], [0], [1], [0, 0, 1, 1], [], []>} : vector<8x8xf32>, vector<8x8xf32>, vector<8x8xf32> -> vector<8x8xf32>
    %cst_29 = arith.constant 0.353553385 : f32
    %32 = vector.broadcast %cst_29 : f32 to vector<8x8xf32>
    %33 = arith.mulf %31, %32 : vector<8x8xf32>
    %cst_30 = arith.constant dense<0xFF800000> : vector<8xf32>
    %34 = vector.multi_reduction <maximumf>, %33, %cst_30 [1] : vector<8x8xf32> to vector<8xf32>
    %35 = vector.shape_cast %34 : vector<8xf32> to vector<8x1xf32>
    %36 = vector.broadcast %35 : vector<8x1xf32> to vector<8x8xf32>
    %37 = arith.subf %33, %36 : vector<8x8xf32>
    %38 = math.exp %37 : vector<8x8xf32>
    %cst_31 = arith.constant dense<0.000000e+00> : vector<8xf32>
    %39 = vector.multi_reduction <add>, %38, %cst_31 [1] : vector<8x8xf32> to vector<8xf32>
    %40 = vector.shape_cast %39 : vector<8xf32> to vector<8x1xf32>
    %41 = vector.broadcast %40 : vector<8x1xf32> to vector<8x8xf32>
    %42 = arith.divf %38, %41 : vector<8x8xf32>
    %cst_32 = arith.constant dense<0.000000e+00> : vector<8x8xf32>
    %43 = tpu.matmul %42, %29, %cst_32 {dimension_numbers = #tpu.dot_dimension_numbers<[1], [0], [0], [1], [0, 0, 1, 1], [], []>} : vector<8x8xf32>, vector<8x8xf32>, vector<8x8xf32> -> vector<8x8xf32>
    %44 = vector.extract_strided_slice %16 {offsets = [0, 8], sizes = [8, 8], strides = [1, 1]} : vector<8x32xf32> to vector<8x8xf32>
    %45 = vector.extract_strided_slice %21 {offsets = [0, 8], sizes = [8, 8], strides = [1, 1]} : vector<8x32xf32> to vector<8x8xf32>
    %46 = vector.extract_strided_slice %26 {offsets = [0, 8], sizes = [8, 8], strides = [1, 1]} : vector<8x32xf32> to vector<8x8xf32>
    %47 = tpu.transpose %45, [1, 0] : vector<8x8xf32> -> vector<8x8xf32>
    %cst_33 = arith.constant dense<0.000000e+00> : vector<8x8xf32>
    %48 = tpu.matmul %44, %47, %cst_33 {dimension_numbers = #tpu.dot_dimension_numbers<[1], [0], [0], [1], [0, 0, 1, 1], [], []>} : vector<8x8xf32>, vector<8x8xf32>, vector<8x8xf32> -> vector<8x8xf32>
    %cst_34 = arith.constant 0.353553385 : f32
    %49 = vector.broadcast %cst_34 : f32 to vector<8x8xf32>
    %50 = arith.mulf %48, %49 : vector<8x8xf32>
    %cst_35 = arith.constant dense<0xFF800000> : vector<8xf32>
    %51 = vector.multi_reduction <maximumf>, %50, %cst_35 [1] : vector<8x8xf32> to vector<8xf32>
    %52 = vector.shape_cast %51 : vector<8xf32> to vector<8x1xf32>
    %53 = vector.broadcast %52 : vector<8x1xf32> to vector<8x8xf32>
    %54 = arith.subf %50, %53 : vector<8x8xf32>
    %55 = math.exp %54 : vector<8x8xf32>
    %cst_36 = arith.constant dense<0.000000e+00> : vector<8xf32>
    %56 = vector.multi_reduction <add>, %55, %cst_36 [1] : vector<8x8xf32> to vector<8xf32>
    %57 = vector.shape_cast %56 : vector<8xf32> to vector<8x1xf32>
    %58 = vector.broadcast %57 : vector<8x1xf32> to vector<8x8xf32>
    %59 = arith.divf %55, %58 : vector<8x8xf32>
    %cst_37 = arith.constant dense<0.000000e+00> : vector<8x8xf32>
    %60 = tpu.matmul %59, %46, %cst_37 {dimension_numbers = #tpu.dot_dimension_numbers<[1], [0], [0], [1], [0, 0, 1, 1], [], []>} : vector<8x8xf32>, vector<8x8xf32>, vector<8x8xf32> -> vector<8x8xf32>
    %61 = vector.extract_strided_slice %16 {offsets = [0, 16], sizes = [8, 8], strides = [1, 1]} : vector<8x32xf32> to vector<8x8xf32>
    %62 = vector.extract_strided_slice %21 {offsets = [0, 16], sizes = [8, 8], strides = [1, 1]} : vector<8x32xf32> to vector<8x8xf32>
    %63 = vector.extract_strided_slice %26 {offsets = [0, 16], sizes = [8, 8], strides = [1, 1]} : vector<8x32xf32> to vector<8x8xf32>
    %64 = tpu.transpose %62, [1, 0] : vector<8x8xf32> -> vector<8x8xf32>
    %cst_38 = arith.constant dense<0.000000e+00> : vector<8x8xf32>
    %65 = tpu.matmul %61, %64, %cst_38 {dimension_numbers = #tpu.dot_dimension_numbers<[1], [0], [0], [1], [0, 0, 1, 1], [], []>} : vector<8x8xf32>, vector<8x8xf32>, vector<8x8xf32> -> vector<8x8xf32>
    %cst_39 = arith.constant 0.353553385 : f32
    %66 = vector.broadcast %cst_39 : f32 to vector<8x8xf32>
    %67 = arith.mulf %65, %66 : vector<8x8xf32>
    %cst_40 = arith.constant dense<0xFF800000> : vector<8xf32>
    %68 = vector.multi_reduction <maximumf>, %67, %cst_40 [1] : vector<8x8xf32> to vector<8xf32>
    %69 = vector.shape_cast %68 : vector<8xf32> to vector<8x1xf32>
    %70 = vector.broadcast %69 : vector<8x1xf32> to vector<8x8xf32>
    %71 = arith.subf %67, %70 : vector<8x8xf32>
    %72 = math.exp %71 : vector<8x8xf32>
    %cst_41 = arith.constant dense<0.000000e+00> : vector<8xf32>
    %73 = vector.multi_reduction <add>, %72, %cst_41 [1] : vector<8x8xf32> to vector<8xf32>
    %74 = vector.shape_cast %73 : vector<8xf32> to vector<8x1xf32>
    %75 = vector.broadcast %74 : vector<8x1xf32> to vector<8x8xf32>
    %76 = arith.divf %72, %75 : vector<8x8xf32>
    %cst_42 = arith.constant dense<0.000000e+00> : vector<8x8xf32>
    %77 = tpu.matmul %76, %63, %cst_42 {dimension_numbers = #tpu.dot_dimension_numbers<[1], [0], [0], [1], [0, 0, 1, 1], [], []>} : vector<8x8xf32>, vector<8x8xf32>, vector<8x8xf32> -> vector<8x8xf32>
    %78 = vector.extract_strided_slice %16 {offsets = [0, 24], sizes = [8, 8], strides = [1, 1]} : vector<8x32xf32> to vector<8x8xf32>
    %79 = vector.extract_strided_slice %21 {offsets = [0, 24], sizes = [8, 8], strides = [1, 1]} : vector<8x32xf32> to vector<8x8xf32>
    %80 = vector.extract_strided_slice %26 {offsets = [0, 24], sizes = [8, 8], strides = [1, 1]} : vector<8x32xf32> to vector<8x8xf32>
    %81 = tpu.transpose %79, [1, 0] : vector<8x8xf32> -> vector<8x8xf32>
    %cst_43 = arith.constant dense<0.000000e+00> : vector<8x8xf32>
    %82 = tpu.matmul %78, %81, %cst_43 {dimension_numbers = #tpu.dot_dimension_numbers<[1], [0], [0], [1], [0, 0, 1, 1], [], []>} : vector<8x8xf32>, vector<8x8xf32>, vector<8x8xf32> -> vector<8x8xf32>
    %cst_44 = arith.constant 0.353553385 : f32
    %83 = vector.broadcast %cst_44 : f32 to vector<8x8xf32>
    %84 = arith.mulf %82, %83 : vector<8x8xf32>
    %cst_45 = arith.constant dense<0xFF800000> : vector<8xf32>
    %85 = vector.multi_reduction <maximumf>, %84, %cst_45 [1] : vector<8x8xf32> to vector<8xf32>
    %86 = vector.shape_cast %85 : vector<8xf32> to vector<8x1xf32>
    %87 = vector.broadcast %86 : vector<8x1xf32> to vector<8x8xf32>
    %88 = arith.subf %84, %87 : vector<8x8xf32>
    %89 = math.exp %88 : vector<8x8xf32>
    %cst_46 = arith.constant dense<0.000000e+00> : vector<8xf32>
    %90 = vector.multi_reduction <add>, %89, %cst_46 [1] : vector<8x8xf32> to vector<8xf32>
    %91 = vector.shape_cast %90 : vector<8xf32> to vector<8x1xf32>
    %92 = vector.broadcast %91 : vector<8x1xf32> to vector<8x8xf32>
    %93 = arith.divf %89, %92 : vector<8x8xf32>
    %cst_47 = arith.constant dense<0.000000e+00> : vector<8x8xf32>
    %94 = tpu.matmul %93, %80, %cst_47 {dimension_numbers = #tpu.dot_dimension_numbers<[1], [0], [0], [1], [0, 0, 1, 1], [], []>} : vector<8x8xf32>, vector<8x8xf32>, vector<8x8xf32> -> vector<8x8xf32>
    %95 = tpu.concatenate %43, %60, %77, %94 in 1 : vector<8x8xf32>, vector<8x8xf32>, vector<8x8xf32>, vector<8x8xf32> -> vector<8x32xf32>
    %c0_48 = arith.constant 0 : index
    %c0_49 = arith.constant 0 : index
    %96 = vector.load %arg12[%c0_48, %c0_49] : memref<32x32xf32, #tpu.memory_space<vmem>>, vector<32x32xf32>
    %cst_50 = arith.constant dense<0.000000e+00> : vector<8x32xf32>
    %97 = tpu.matmul %95, %96, %cst_50 {dimension_numbers = #tpu.dot_dimension_numbers<[1], [0], [0], [1], [0, 0, 1, 1], [], []>} : vector<8x32xf32>, vector<32x32xf32>, vector<8x32xf32> -> vector<8x32xf32>
    %c0_51 = arith.constant 0 : index
    %c0_52 = arith.constant 0 : index
    %98 = vector.load %arg13[%c0_51, %c0_52] : memref<1x32xf32, #tpu.memory_space<vmem>>, vector<1x32xf32>
    %99 = vector.broadcast %98 : vector<1x32xf32> to vector<8x32xf32>
    %100 = arith.addf %97, %99 : vector<8x32xf32>
    %c0_53 = arith.constant 0 : index
    %c0_54 = arith.constant 0 : index
    %c0_55 = arith.constant 0 : index
    %101 = vector.load %arg1[%c0_53, %c0_54, %c0_55] : memref<1x8x32xf32, #tpu.memory_space<vmem>>, vector<1x8x32xf32>
    %102 = vector.shape_cast %101 : vector<1x8x32xf32> to vector<8x32xf32>
    %103 = arith.addf %100, %102 : vector<8x32xf32>
    %cst_56 = arith.constant dense<0.000000e+00> : vector<8xf32>
    %104 = vector.multi_reduction <add>, %103, %cst_56 [1] : vector<8x32xf32> to vector<8xf32>
    %105 = vector.shape_cast %104 : vector<8xf32> to vector<8x1xf32>
    %cst_57 = arith.constant 3.200000e+01 : f32
    %106 = vector.broadcast %cst_57 : f32 to vector<8x1xf32>
    %107 = arith.divf %105, %106 : vector<8x1xf32>
    %108 = vector.broadcast %107 : vector<8x1xf32> to vector<8x32xf32>
    %109 = arith.subf %103, %108 : vector<8x32xf32>
    %110 = arith.mulf %109, %109 : vector<8x32xf32>
    %cst_58 = arith.constant dense<0.000000e+00> : vector<8xf32>
    %111 = vector.multi_reduction <add>, %110, %cst_58 [1] : vector<8x32xf32> to vector<8xf32>
    %112 = vector.shape_cast %111 : vector<8xf32> to vector<8x1xf32>
    %cst_59 = arith.constant 3.200000e+01 : f32
    %113 = vector.broadcast %cst_59 : f32 to vector<8x1xf32>
    %114 = arith.divf %112, %113 : vector<8x1xf32>
    %115 = vector.broadcast %107 : vector<8x1xf32> to vector<8x32xf32>
    %116 = arith.subf %103, %115 : vector<8x32xf32>
    %cst_60 = arith.constant 9.99999974E-6 : f32
    %117 = vector.broadcast %cst_60 : f32 to vector<8x1xf32>
    %118 = arith.addf %114, %117 : vector<8x1xf32>
    %119 = math.rsqrt %118 : vector<8x1xf32>
    %120 = vector.broadcast %119 : vector<8x1xf32> to vector<8x32xf32>
    %121 = arith.mulf %116, %120 : vector<8x32xf32>
    %c0_61 = arith.constant 0 : index
    %c0_62 = arith.constant 0 : index
    %122 = vector.load %arg14[%c0_61, %c0_62] : memref<1x32xf32, #tpu.memory_space<vmem>>, vector<1x32xf32>
    %123 = vector.broadcast %122 : vector<1x32xf32> to vector<8x32xf32>
    %124 = arith.mulf %121, %123 : vector<8x32xf32>
    %c0_63 = arith.constant 0 : index
    %c0_64 = arith.constant 0 : index
    %125 = vector.load %arg15[%c0_63, %c0_64] : memref<1x32xf32, #tpu.memory_space<vmem>>, vector<1x32xf32>
    %126 = vector.broadcast %125 : vector<1x32xf32> to vector<8x32xf32>
    %127 = arith.addf %124, %126 : vector<8x32xf32>
    %c0_65 = arith.constant 0 : index
    %c0_66 = arith.constant 0 : index
    %128 = vector.load %arg16[%c0_65, %c0_66] : memref<32x256xf32, #tpu.memory_space<vmem>>, vector<32x256xf32>
    %cst_67 = arith.constant dense<0.000000e+00> : vector<8x256xf32>
    %129 = tpu.matmul %127, %128, %cst_67 {dimension_numbers = #tpu.dot_dimension_numbers<[1], [0], [0], [1], [0, 0, 1, 1], [], []>} : vector<8x32xf32>, vector<32x256xf32>, vector<8x256xf32> -> vector<8x256xf32>
    %c0_68 = arith.constant 0 : index
    %c0_69 = arith.constant 0 : index
    %130 = vector.load %arg17[%c0_68, %c0_69] : memref<1x256xf32, #tpu.memory_space<vmem>>, vector<1x256xf32>
    %131 = vector.broadcast %130 : vector<1x256xf32> to vector<8x256xf32>
    %132 = arith.addf %129, %131 : vector<8x256xf32>
    %cst_70 = arith.constant 0.000000e+00 : f32
    %133 = vector.broadcast %cst_70 : f32 to vector<8x256xf32>
    %134 = arith.maximumf %132, %133 : vector<8x256xf32>
    %c0_71 = arith.constant 0 : index
    %c0_72 = arith.constant 0 : index
    %135 = vector.load %arg18[%c0_71, %c0_72] : memref<256x32xf32, #tpu.memory_space<vmem>>, vector<256x32xf32>
    %cst_73 = arith.constant dense<0.000000e+00> : vector<8x32xf32>
    %136 = tpu.matmul %134, %135, %cst_73 {dimension_numbers = #tpu.dot_dimension_numbers<[1], [0], [0], [1], [0, 0, 1, 1], [], []>} : vector<8x256xf32>, vector<256x32xf32>, vector<8x32xf32> -> vector<8x32xf32>
    %c0_74 = arith.constant 0 : index
    %c0_75 = arith.constant 0 : index
    %137 = vector.load %arg19[%c0_74, %c0_75] : memref<1x32xf32, #tpu.memory_space<vmem>>, vector<1x32xf32>
    %138 = vector.broadcast %137 : vector<1x32xf32> to vector<8x32xf32>
    %139 = arith.addf %136, %138 : vector<8x32xf32>
    %140 = arith.addf %127, %139 : vector<8x32xf32>
    %cst_76 = arith.constant dense<0.000000e+00> : vector<8xf32>
    %141 = vector.multi_reduction <add>, %140, %cst_76 [1] : vector<8x32xf32> to vector<8xf32>
    %142 = vector.shape_cast %141 : vector<8xf32> to vector<8x1xf32>
    %cst_77 = arith.constant 3.200000e+01 : f32
    %143 = vector.broadcast %cst_77 : f32 to vector<8x1xf32>
    %144 = arith.divf %142, %143 : vector<8x1xf32>
    %145 = vector.broadcast %144 : vector<8x1xf32> to vector<8x32xf32>
    %146 = arith.subf %140, %145 : vector<8x32xf32>
    %147 = arith.mulf %146, %146 : vector<8x32xf32>
    %cst_78 = arith.constant dense<0.000000e+00> : vector<8xf32>
    %148 = vector.multi_reduction <add>, %147, %cst_78 [1] : vector<8x32xf32> to vector<8xf32>
    %149 = vector.shape_cast %148 : vector<8xf32> to vector<8x1xf32>
    %cst_79 = arith.constant 3.200000e+01 : f32
    %150 = vector.broadcast %cst_79 : f32 to vector<8x1xf32>
    %151 = arith.divf %149, %150 : vector<8x1xf32>
    %152 = vector.broadcast %144 : vector<8x1xf32> to vector<8x32xf32>
    %153 = arith.subf %140, %152 : vector<8x32xf32>
    %cst_80 = arith.constant 9.99999974E-6 : f32
    %154 = vector.broadcast %cst_80 : f32 to vector<8x1xf32>
    %155 = arith.addf %151, %154 : vector<8x1xf32>
    %156 = math.rsqrt %155 : vector<8x1xf32>
    %157 = vector.broadcast %156 : vector<8x1xf32> to vector<8x32xf32>
    %158 = arith.mulf %153, %157 : vector<8x32xf32>
    %c0_81 = arith.constant 0 : index
    %c0_82 = arith.constant 0 : index
    %159 = vector.load %arg20[%c0_81, %c0_82] : memref<1x32xf32, #tpu.memory_space<vmem>>, vector<1x32xf32>
    %160 = vector.broadcast %159 : vector<1x32xf32> to vector<8x32xf32>
    %161 = arith.mulf %158, %160 : vector<8x32xf32>
    %c0_83 = arith.constant 0 : index
    %c0_84 = arith.constant 0 : index
    %162 = vector.load %arg21[%c0_83, %c0_84] : memref<1x32xf32, #tpu.memory_space<vmem>>, vector<1x32xf32>
    %163 = vector.broadcast %162 : vector<1x32xf32> to vector<8x32xf32>
    %164 = arith.addf %161, %163 : vector<8x32xf32>
    %c0_85 = arith.constant 0 : index
    %c0_86 = arith.constant 0 : index
    %c0_87 = arith.constant 0 : index
    %165 = vector.load %arg22[%c0_85, %c0_86, %c0_87] : memref<1x8x32xf32, #tpu.memory_space<vmem>>, vector<1x8x32xf32>
    %166 = vector.shape_cast %165 : vector<1x8x32xf32> to vector<8x32xf32>
    %167 = vector.shape_cast %164 : vector<8x32xf32> to vector<1x8x32xf32>
    tpu.vector_store %arg22[%c0_85, %c0_86, %c0_87], %167 {strides = array<i32>} : memref<1x8x32xf32, #tpu.memory_space<vmem>>, vector<1x8x32xf32>,
    return
  }
  func.func @transform_0(%arg0: i32) -> (i32, i32, i32) {
    %c0_i32 = arith.constant 0 : i32
    %c0_i32_0 = arith.constant 0 : i32
    %c0_i32_1 = arith.constant 0 : i32
    return %arg0, %c0_i32, %c0_i32_0 : i32, i32, i32
  }
  func.func @transform_1(%arg0: i32) -> (i32, i32, i32) {
    %c0_i32 = arith.constant 0 : i32
    %c0_i32_0 = arith.constant 0 : i32
    %c0_i32_1 = arith.constant 0 : i32
    return %arg0, %c0_i32, %c0_i32_0 : i32, i32, i32
  }
  func.func @transform_2(%arg0: i32) -> (i32, i32, i32) {
    %c0_i32 = arith.constant 0 : i32
    %c0_i32_0 = arith.constant 0 : i32
    %c0_i32_1 = arith.constant 0 : i32
    return %arg0, %c0_i32, %c0_i32_0 : i32, i32, i32
  }
  func.func @transform_3(%arg0: i32) -> (i32, i32, i32) {
    %c0_i32 = arith.constant 0 : i32
    %c0_i32_0 = arith.constant 0 : i32
    %c0_i32_1 = arith.constant 0 : i32
    return %arg0, %c0_i32, %c0_i32_0 : i32, i32, i32
  }
  func.func @transform_4(%arg0: i32) -> (i32, i32, i32) {
    %c0_i32 = arith.constant 0 : i32
    %c0_i32_0 = arith.constant 0 : i32
    %c0_i32_1 = arith.constant 0 : i32
    return %arg0, %c0_i32, %c0_i32_0 : i32, i32, i32
  }
  func.func @transform_5(%arg0: i32) -> (i32, i32) {
    %c0_i32 = arith.constant 0 : i32
    %c0_i32_0 = arith.constant 0 : i32
    %c0_i32_1 = arith.constant 0 : i32
    return %c0_i32, %c0_i32_0 : i32, i32
  }
  func.func @transform_6(%arg0: i32) -> (i32, i32) {
    %c0_i32 = arith.constant 0 : i32
    %c0_i32_0 = arith.constant 0 : i32
    %c0_i32_1 = arith.constant 0 : i32
    return %c0_i32, %c0_i32_0 : i32, i32
  }
  func.func @transform_7(%arg0: i32) -> (i32, i32) {
    %c0_i32 = arith.constant 0 : i32
    %c0_i32_0 = arith.constant 0 : i32
    %c0_i32_1 = arith.constant 0 : i32
    return %c0_i32, %c0_i32_0 : i32, i32
  }
  func.func @transform_8(%arg0: i32) -> (i32, i32) {
    %c0_i32 = arith.constant 0 : i32
    %c0_i32_0 = arith.constant 0 : i32
    %c0_i32_1 = arith.constant 0 : i32
    return %c0_i32, %c0_i32_0 : i32, i32
  }
  func.func @transform_9(%arg0: i32) -> (i32, i32) {
    %c0_i32 = arith.constant 0 : i32
    %c0_i32_0 = arith.constant 0 : i32
    %c0_i32_1 = arith.constant 0 : i32
    return %c0_i32, %c0_i32_0 : i32, i32
  }
  func.func @transform_10(%arg0: i32) -> (i32, i32) {
    %c0_i32 = arith.constant 0 : i32
    %c0_i32_0 = arith.constant 0 : i32
    %c0_i32_1 = arith.constant 0 : i32
    return %c0_i32, %c0_i32_0 : i32, i32
  }
  func.func @transform_11(%arg0: i32) -> (i32, i32) {
    %c0_i32 = arith.constant 0 : i32
    %c0_i32_0 = arith.constant 0 : i32
    %c0_i32_1 = arith.constant 0 : i32
    return %c0_i32, %c0_i32_0 : i32, i32
  }
  func.func @transform_12(%arg0: i32) -> (i32, i32) {
    %c0_i32 = arith.constant 0 : i32
    %c0_i32_0 = arith.constant 0 : i32
    %c0_i32_1 = arith.constant 0 : i32
    return %c0_i32, %c0_i32_0 : i32, i32
  }
  func.func @transform_13(%arg0: i32) -> (i32, i32) {
    %c0_i32 = arith.constant 0 : i32
    %c0_i32_0 = arith.constant 0 : i32
    %c0_i32_1 = arith.constant 0 : i32
    return %c0_i32, %c0_i32_0 : i32, i32
  }
  func.func @transform_14(%arg0: i32) -> (i32, i32) {
    %c0_i32 = arith.constant 0 : i32
    %c0_i32_0 = arith.constant 0 : i32
    %c0_i32_1 = arith.constant 0 : i32
    return %c0_i32, %c0_i32_0 : i32, i32
  }
  func.func @transform_15(%arg0: i32) -> (i32, i32) {
    %c0_i32 = arith.constant 0 : i32
    %c0_i32_0 = arith.constant 0 : i32
    %c0_i32_1 = arith.constant 0 : i32
    return %c0_i32, %c0_i32_0 : i32, i32
  }
  func.func @transform_16(%arg0: i32) -> (i32, i32) {
    %c0_i32 = arith.constant 0 : i32
    %c0_i32_0 = arith.constant 0 : i32
    %c0_i32_1 = arith.constant 0 : i32
    return %c0_i32, %c0_i32_0 : i32, i32
  }
  func.func @transform_17(%arg0: i32) -> (i32, i32) {
    %c0_i32 = arith.constant 0 : i32
    %c0_i32_0 = arith.constant 0 : i32
    %c0_i32_1 = arith.constant 0 : i32
    return %c0_i32, %c0_i32_0 : i32, i32
  }
  func.func @transform_18(%arg0: i32) -> (i32, i32) {
    %c0_i32 = arith.constant 0 : i32
    %c0_i32_0 = arith.constant 0 : i32
    %c0_i32_1 = arith.constant 0 : i32
    return %c0_i32, %c0_i32_0 : i32, i32
  }
  func.func @transform_19(%arg0: i32) -> (i32, i32) {
    %c0_i32 = arith.constant 0 : i32
    %c0_i32_0 = arith.constant 0 : i32
    %c0_i32_1 = arith.constant 0 : i32
    return %c0_i32, %c0_i32_0 : i32, i32
  }
  func.func @transform_20(%arg0: i32) -> (i32, i32) {
    %c0_i32 = arith.constant 0 : i32
    %c0_i32_0 = arith.constant 0 : i32
    %c0_i32_1 = arith.constant 0 : i32
    return %c0_i32, %c0_i32_0 : i32, i32
  }
  func.func @transform_21(%arg0: i32) -> (i32, i32, i32) {
    %c0_i32 = arith.constant 0 : i32
    %c0_i32_0 = arith.constant 0 : i32
    %c0_i32_1 = arith.constant 0 : i32
    return %arg0, %c0_i32, %c0_i32_0 : i32, i32, i32
  }
}

</mosaic_0001>

<bundles_post_ra>
// kernel: tpu_custom_call.1
= control target key start
LH: loop header
LB: loop body
LE: loop exit
PB: predicated region body
PF: predicated region fallthrough
CT: control target
= control target key end

     0   :  { %s2981_s0 = inlined_call_operand.vmem [shape: f32[2,8,32], index: 0, kind: input, shape index: {}]   ;;  %s2982_s1 = inlined_call_operand.vmem [shape: f32[2,8,32], index: 1, kind: input, shape index: {}]   ;;  %s2983_s2 = inlined_call_operand.vmem [shape: f32[2,8,32], index: 2, kind: input, shape index: {}]   ;;  %s2984_s3 = inlined_call_operand.vmem [shape: f32[2,8,32], index: 3, kind: input, shape index: {}]   ;;  %s2985_s4 = inlined_call_operand.vmem [shape: f32[2,8,32], index: 4, kind: input, shape index: {}]   ;;  %s2986_s5 = inlined_call_operand.vmem [shape: f32[32,32], index: 5, kind: input, shape index: {}]   ;;  %s2987_s6 = inlined_call_operand.vmem [shape: f32[1,32], index: 6, kind: input, shape index: {}]   ;;  %s2988_s7 = inlined_call_operand.vmem [shape: f32[32,32], index: 7, kind: input, shape index: {}]   ;;  %s2989_s8 = inlined_call_operand.vmem [shape: f32[1,32], index: 8, kind: input, shape index: {}]   ;;  %s2990_s9 = inlined_call_operand.vmem [shape: f32[32,32], index: 9, kind: input, shape index: {}]   ;;  %s2991_s10 = inlined_call_operand.vmem [shape: f32[1,32], index: 10, kind: input, shape index: {}]   ;;  %s2992_s11 = inlined_call_operand.vmem [shape: f32[32,32], index: 11, kind: input, shape index: {}]   ;;  %s2993_s12 = inlined_call_operand.vmem [shape: f32[1,32], index: 12, kind: input, shape index: {}]   ;;  %s2994_s13 = inlined_call_operand.vmem [shape: f32[1,32], index: 13, kind: input, shape index: {}]   ;;  %s2995_s14 = inlined_call_operand.vmem [shape: f32[1,32], index: 14, kind: input, shape index: {}]   ;;  %s2996_s15 = inlined_call_operand.vmem [shape: f32[32,256], index: 15, kind: input, shape index: {}]   ;;  %s2997_s16 = inlined_call_operand.vmem [shape: f32[1,256], index: 16, kind: input, shape index: {}]   ;;  %s2998_s17 = inlined_call_operand.vmem [shape: f32[256,32], index: 17, kind: input, shape index: {}]   ;;  %s2999_s18 = inlined_call_operand.vmem [shape: f32[1,32], index: 18, kind: input, shape index: {}]   ;;  %s3000_s19 = inlined_call_operand.vmem [shape: f32[1,32], index: 19, kind: input, shape index: {}]   ;;  %s3001_s20 = inlined_call_operand.vmem [shape: f32[1,32], index: 20, kind: input, shape index: {}]   ;;  %s3002_s21 = inlined_call_operand.hbm [shape: f32[2,8,32], index: 21, kind: output, shape index: {}]  }
   0x1   :  { %3012 = sst [smem:[#allocation11_spill]] %s2981_s0 }
   0x2   :  { %3013 = sst [smem:[#allocation12_spill]] %s2982_s1 }
   0x3   :  { %3014 = sst [smem:[#allocation13_spill]] %s2983_s2 }
   0x4   :  { %3015 = sst [smem:[#allocation14_spill]] %s2984_s3 }
   0x5   :  { %3016 = sst [smem:[#allocation15_spill]] %s2985_s4 }
   0x6   :  { %3017 = sst [smem:[#allocation16_spill]] %s2986_s5 }
   0x7   :  { %3018 = sst [smem:[#allocation17_spill]] %s2987_s6 }
   0x8   :  { %3019 = sst [smem:[#allocation18_spill]] %s2988_s7 }
   0x9   :  { %3020 = sst [smem:[#allocation19_spill]] %s3002_s21 }
   0xa   :  { %26 = vsyncpa [#allocation3], 0 }
   0xb   :  { %28 = vsyncpa [#allocation3 + $0x1], 0  ;;  %s2573_s2 = smov 0   ;;  %s2575_s25 = smov 0  }
   0xc   :  { %s2577_s26 = smov 0   ;;  %s2579_s27 = smov 0  }
   0xd LB: > { %3021 = sst [smem:[#allocation5_spill]] %s2440_s2  ;;  %s2594_s3 = sadd.s32 4294967295, %s2452_s27   ;;  %s2452_s27 = sphi %s2579_s27, %s3042_s27   ;;  %s2448_s26 = sphi %s2577_s26, %s3044_s26   ;;  %s2444_s25 = sphi %s2575_s25, %s3046_s25   ;;  %s2440_s2 = sphi %s2573_s2, %s3045_s2  }
   0xe   : > { %3022 = sst [smem:[#allocation6_spill]] %s2448_s26  ;;  %s2130_s28 = sadd.s32 4294967294, %s2452_s27  }
   0xf   : > { %3023 = sst [smem:[#allocation7_spill]] %s2452_s27  ;;  %s2598_s29 = sadd.s32 1, %s2452_s27  }
  0x10   : > { %3024 = sst [smem:[#allocation8_spill]] %s2598_s29  ;;  %s507_s0 = sadd.s32 1, %s2448_s26 }
  0x11   : > { %s504_s4 = ssub.s32 %s2452_s27, %s2598_s29  ;;  %p517_p0 = scmp.ne.s32.totalorder %s2448_s26, %s2444_s25 }
  0x12   : > { %p505_p1 = scmp.eq.s32.totalorder %s504_s4, 0  ;;  %p518_p2 = scmp.eq.s32.totalorder %s2594_s3, 1 }
  0x13   : > { %p523_p3 = scmp.ne.s32.totalorder %s2444_s25, %s2440_s2  ;;  %p524_p4 = scmp.eq.s32.totalorder %s2130_s28, 1 }
  0x14   : > { %s2609_s30 = scalar_select %p505_p1, %s2448_s26, %s507_s0  }
  0x15   : > { %p2611_p5 = por %p518_p2, %p517_p0  ;;  %p2615_p6 = por %p524_p4, %p523_p3 }
  0x16   : > { %3025 = sst [smem:[#allocation9_spill]] %s2609_s30  ;;  %p2133_p7 = scmp.ge.s32.totalorder %s2452_s27, 1 }
  0x17   : > { %s3027_s22 = scalar_select %p2615_p6, 1, 0 }
  0x18   : > { %p625_p8 = scmp.lt.s32.totalorder %s2452_s27, 3 }
  0x19   : > { %3028 = sst [smem:[#allocation10_spill]] %s3027_s22 }
  0x1a   : > { %p626_p9 = pnand %p2133_p7, %p625_p8 }
  0x1b   : > { %s3029_s24 = sld [smem:[#allocation16_spill]] (!%p626_p9)  ;;  %p700_p10 = scmp.lt.s32.totalorder (!%p626_p9), %s2594_s3, 1 }
  0x1c   : > { %629 = sbr.rel (%p626_p9) target bundleno = 2416 (0x970), region = 104  ;;  %s3030_s23 = sld [smem:[#allocation11_spill]] (!%p626_p9) }
  0x1d   : > { %s3031_s27 = sld [smem:[#allocation14_spill]] (!%p626_p9)  ;;  %s2456_s2 = smov (!%p626_p9), 112  }
  0x1e   : > { %s3032_s7 = sld [smem:[#allocation18_spill]] (!%p626_p9) }
  0x1f   : > { %s3033_s29 = sld [smem:[#allocation12_spill]] (!%p626_p9) }
  0x20   : > { %s3035_s30 = sld [smem:[#allocation13_spill]] (!%p626_p9) }
  0x21   : > { %v730_v0 = vld [vmem:[%s3029_s24 + $0x18] sm:$0xff]  ;;  %v2454_v1 = vmov 0.0   ;;  %v729_v2 = vld [vmem:[%s3029_s24 + $0x10] sm:$0xff]  ;;  %vm2455_vm0 = vmmov 0   ;;  %s701_s4 = scalar_select %p700_p10, %s2594_s3, 1  ;;  %v728_v3 = vld [vmem:[%s3029_s24 + $0x8] sm:$0xff] }
  0x22   : > { %2241 = vmatprep.subr.mxu1 %v2454_v1  ;;  %2249 = vmatprep.mubr.msk.f32.mxu1 %vm2455_vm0, %v2454_v1  ;;  %v727_v4 = vld [vmem:[%s3029_s24] sm:$0xff]  ;;  %vm738_vm1 = vcmask 261120   ;;  %v899_v15 = vld [vmem:[%s2990_s9 + $0x18] sm:$0xff]  ;;  %v898_v16 = vld [vmem:[%s2990_s9 + $0x10] sm:$0xff]  ;;  %vm980_vm2 = vcmask 64512   ;;  %s3036_s6 = sld [smem:[#allocation17_spill]] }
  0x23   : > { %2242 = vmatpush3.msra.mxu1 %v730_v0  ;;  %2284 = vmatprep.subr.mxu0 %v2454_v1  ;;  %s2639_s28 = sshll.u32 %s701_s4, 3  ;;  %v897_v17 = vld [vmem:[%s2990_s9 + $0x8] sm:$0xff]  ;;  %v896_v18 = vld [vmem:[%s2990_s9] sm:$0xff]  ;;  %vm1654_vm3 = vcmask 130048   ;;  %vm1656_vm4 = vcmask 195584   ;;  %s2462_s4 = smov [#allocation2]  }
  0x24   : > { %2243 = vmatprep.subr.mxu1 %v2454_v1  ;;  %2286 = vmatprep.mubr.msk.f32.mxu0 %vm2455_vm0, %v2454_v1  ;;  %s703_s1 = scalar_lea.vmem %s3030_s23, %s2639_s28  ;;  %s715_s21 = scalar_lea.vmem %s3031_s27, %s2639_s28  ;;  %v815_v8 = vld [vmem:[%s3032_s7 + $0x18] sm:$0xff]  ;;  %v814_v9 = vld [vmem:[%s3032_s7 + $0x10] sm:$0xff]  ;;  %v813_v12 = vld [vmem:[%s3032_s7 + $0x8] sm:$0xff] }
  0x25   : > { %2244 = vmatpush3.msra.mxu1 %v729_v2  ;;  %v2653_v5 = vld [vmem:[%s703_s1] sm:$0xff]  ;;  %s707_s23 = scalar_lea.vmem %s3033_s29, %s2639_s28  ;;  %s3034_s27 = sld [smem:[#allocation15_spill]] }
  0x26   : > { %2245 = vmatprep.subr.mxu1 %v2454_v1  ;;  %v721_v6 = vld [vmem:[%s715_s21] sm:$0xff]  ;;  %s711_s0 = scalar_lea.vmem %s3035_s30, %s2639_s28  ;;  %s2396_s24 = sshll.u32 %s2462_s4, 4  ;;  %s2397_s24 = int_to_ptr.vmem [resolvable:$false] %s2396_s24 }
  0x27   : > { %2246 = vmatpush3.msra.mxu1 %v728_v3  ;;  %v722_v7 = vadd.f32 %v721_v6, %v2653_v5  ;;  %v723_v10 = vld [vmem:[%s707_s23] sm:$0xff] }
  0x28   : > { %2247 = vmatprep.subr.mxu1 %v2454_v1  ;;  %v812_v13 = vld [vmem:[%s3032_s7] sm:$0xff] }
  0x29   : > { %2248 = vmatpush3.msra.mxu1 %v727_v4  ;;  %v726_v19 = vld [vmem:[%s711_s0] sm:$0xff]  ;;  %s2167_s0 = sshll.u32 %s2594_s3, 7  ;;  %s2398_s3 = scalar_lea.vmem %s2397_s24, 256 }
  0x2a   : > { %2250 = vmatmul.mubr.msk.f32.vlgmr.msra.gmra.mxu1 %vm738_vm1, %v722_v7  ;;  %2252 = vmatprep.subr.mxu1 %v2454_v1  ;;  %v2142_v22 = vld [vmem:[%s2989_s8] ss:$0 sm:$0xff] }
  0x2b   : > { %s719_s22 = scalar_lea.vmem %s3034_s27, %s2639_s28  ;;  %2253 = vmatpush3.msra.mxu1 %v815_v8  ;;  %2260 = vmatprep.mubr.msk.f32.mxu1 %vm2455_vm0, %v2454_v1  ;;  %v2140_v25 = vld [vmem:[%s3036_s6] ss:$0 sm:$0xff]  ;;  %s2457_s27 = smov 120  }
  0x2c   : > { %v724_v11 = vld [vmem:[%s719_s22] sm:$0xff]  ;;  %2254 = vmatprep.subr.mxu1 %v2454_v1  ;;  %s2458_s22 = smov 104  }
  0x2d   : > { %2255 = vmatpush3.msra.mxu1 %v814_v9  ;;  %v725_v14 = vadd.f32 %v724_v11, %v723_v10  ;;  %v2144_v28 = vld [vmem:[%s2991_s10] ss:$0 sm:$0xff] }
  0x2e   : > { %2256 = vmatprep.subr.mxu1 %v2454_v1 }
  0x2f   : > { %2257 = vmatpush3.msra.mxu1 %v813_v12 }
  0x30   : > { %2258 = vmatprep.subr.mxu1 %v2454_v1 }
  0x31   : > { %2259 = vmatpush3.msra.mxu1 %v812_v13 }
  0x32   : > { %2261 = vmatmul.mubr.msk.f32.vlgmr.msra.gmra.mxu1 %vm738_vm1, %v725_v14  ;;  %2263 = vmatprep.subr.mxu1 %v2454_v1 }
  0x33   : > { %2271 = vmatprep.mubr.msk.f32.mxu1 %vm2455_vm0, %v2454_v1  ;;  %2264 = vmatpush3.msra.mxu1 %v899_v15 }
  0x34   : > { %2265 = vmatprep.subr.mxu1 %v2454_v1 }
  0x35   : > { %2266 = vmatpush3.msra.mxu1 %v898_v16 }
  0x36   : > { %2267 = vmatprep.subr.mxu1 %v2454_v1 }
  0x37   : > { %2268 = vmatpush3.msra.mxu1 %v897_v17 }
  0x38   : > { %2269 = vmatprep.subr.mxu1 %v2454_v1 }
  0x39   : > { %2270 = vmatpush3.msra.mxu1 %v896_v18 }
  0x3a   : > { %2272 = vmatmul.mubr.msk.f32.vlgmr.msra.gmra.mxu1 %vm738_vm1, %v726_v19  ;;  %2274 = vmatprep.subr.mxu1 %v2454_v1 }
  0x3b   : > { %2276 = vmatprep.mubr.msk.f32.mxu1 %vm2455_vm0, %v2454_v1 }
  0xea   : > { %v808_v20 = vpop.f32.mrf.mxu1 }
  0xeb   : > { %v809_v27 = vadd.f32 %v2140_v25, %v808_v20 }
  0xec   : > { %v2251_v21 = vpop.f32.mrf.mxu1 }
  0xf2   : > { %v892_v23 = vpop.f32.mrf.mxu1 }
  0xf3   : > { %v893_v24 = vadd.f32 %v2142_v22, %v892_v23 }
  0xf4   : > { %v2262_v26 = vpop.f32.mrf.mxu1 }
  0xf5   : > { %1311 = vrot.lane.b32.xlu1 %v893_v24, %s2456_s2  ;;  %1144 = vrot.lane.b32.xlu0 %v893_v24, %s2457_s27 }
  0xf6   : > { %2275 = vmatpush3.xpose.msk.msra.mxu1 %vm980_vm2, %v893_v24 }
  0xf7   : > { %2279 = vmatprep.subr.mxu1 %v2454_v1 }
  0xf9   : > { %2277 = vmatmul.mubr.msk.f32.vlgmr.msra.gmra.mxu1 %vm980_vm2, %v809_v27  ;;  %1309 = vrot.lane.b32.xlu1 %v809_v27, %s2456_s2 }
  0xfa   : > { %1142 = vrot.lane.b32.xlu0 %v809_v27, %s2457_s27  ;;  %2281 = vmatprep.mubr.msk.f32.mxu1 %vm2455_vm0, %v2454_v1  ;;  %v976_v29 = vpop.f32.mrf.mxu1 }
  0xfb   : > { %v2731_v30 = vadd.f32 %v2144_v28, %v976_v29  ;;  %v1661_v29 = vld [vmem:[%s2992_s11 + $0x18] sm:$0xff] }
  0xfc   : > { %v2273_v31 = vpop.f32.mrf.mxu1 }
  0xfd   : > { %1475 = vrot.lane.b32.xlu1 %v809_v27, %s2458_s22  ;;  %2280 = vmatpush3.msra.mxu1 %v2731_v30  ;;  %v1659_v31 = vld [vmem:[%s2992_s11 + $0x8] sm:$0xff] }
  0xfe   : > { %1477 = vrot.lane.b32.xlu0 %v893_v24, %s2458_s22  ;;  %2289 = vmatprep.subr.mxu1 %v2454_v1 }
 0x167   : > { %v1145_v32 = vpop.permute.xlu0 %1144  ;;  %v1312_v33 = vpop.permute.xlu1 %1311 }
 0x168   : > { %2285 = vmatpush3.xpose.msk.msra.mxu0 %vm980_vm2, %v1145_v32  ;;  %v1658_v32 = vld [vmem:[%s2992_s11] sm:$0xff] }
 0x169   : > { %2294 = vmatprep.subr.mxu0 %v2454_v1 }
 0x16b   : > { %v1310_v35 = vpop.permute.xlu1 %1309 }
 0x16c   : > { %v1143_v34 = vpop.permute.xlu0 %1142 }
 0x16d   : > { %2287 = vmatmul.mubr.msk.f32.vlgmr.msra.gmra.mxu0 %vm980_vm2, %v1143_v34 }
 0x16e   : > { %2295 = vmatpush3.xpose.msk.msra.mxu0 %vm980_vm2, %v1312_v33  ;;  %2296 = vmatprep.mubr.msk.f32.mxu0 %vm2455_vm0, %v2454_v1 }
 0x16f   : > { %2304 = vmatprep.subr.mxu0 %v2454_v1  ;;  %v1476_v37 = vpop.permute.xlu1 %1475 }
 0x170   : > { %v1478_v36 = vpop.permute.xlu0 %1477 }
 0x171   : > { %2297 = vmatmul.mubr.msk.f32.vlgmr.msra.gmra.mxu0 %vm980_vm2, %v1310_v35 }
 0x172   : > { %2305 = vmatpush3.xpose.msk.msra.mxu0 %vm980_vm2, %v1478_v36  ;;  %2306 = vmatprep.mubr.msk.f32.mxu0 %vm2455_vm0, %v2454_v1 }
 0x173   : > { %2314 = vmatprep.subr.mxu0 %v2454_v1 }
 0x175   : > { %2307 = vmatmul.mubr.msk.f32.vlgmr.msra.gmra.mxu0 %vm980_vm2, %v1476_v37 }
 0x176   : > { %2322 = vmatprep.mubr.msk.f32.mxu0 %vm2455_vm0, %v2454_v1  ;;  %2315 = vmatpush3.msra.mxu0 %v1661_v29 }
 0x177   : > { %2316 = vmatprep.subr.mxu0 %v2454_v1 }
 0x1b9   : > { %v1053_v38 = vpop.f32.mrf.mxu1 }
 0x1ba   : > { %v1057_v39 = vmul.f32 0.35355338, %v1053_v38 }
 0x1bb   : > { %v2278_v40 = vpop.f32.mrf.mxu1 }
 0x1bc   : > { %v1058_v41 = vsel %vm980_vm2, %v1057_v39, -inf }
 0x1bd   : > { %1059 = vmax.xlane.f32.xlu0 %v1058_v41 }
 0x22d   : > { %v1216_v42 = vpop.f32.mrf.mxu0 }
 0x22e   : > { %v1220_v43 = vmul.f32 0.35355338, %v1216_v42 }
 0x22f   : > { %v2288_v44 = vpop.f32.mrf.mxu0 }
 0x230   : > { %v1221_v45 = vsel %vm980_vm2, %v1220_v43, -inf  ;;  %v2158_v44 = vld [vmem:[%s2993_s12] ss:$0 sm:$0xff] }
 0x231   : > { %1222 = vmax.xlane.f32.xlu1 %v1221_v45  ;;  %v1383_v46 = vpop.f32.mrf.mxu0 }
 0x232   : > { %v1387_v47 = vmul.f32 0.35355338, %v1383_v46 }
 0x233   : > { %v2298_v48 = vpop.f32.mrf.mxu0 }
 0x234   : > { %v1388_v49 = vsel %vm980_vm2, %v1387_v47, -inf }
 0x235   : > { %v1549_v50 = vpop.f32.mrf.mxu0  ;;  %1389 = vmax.xlane.f32.xlu0 %v1388_v49 }
 0x236   : > { %v1553_v51 = vmul.f32 0.35355338, %v1549_v50 }
 0x237   : > { %v2308_v52 = vpop.f32.mrf.mxu0 }
 0x238   : > { %v1554_v53 = vsel %vm980_vm2, %v1553_v51, -inf }
 0x239   : > { %1555 = vmax.xlane.f32.xlu0 %v1554_v53 }
 0x242   : > { %1233 = vrot.lane.b32.xlu1 %v2731_v30, %s2457_s27  ;;  %s2460_s27 = smov 16  }
 0x246   : > { %v1060_v54 = vpop.xlane.xlu0 %1059 }
 0x247   : > { %v1061_v55 = vsub.f32 %v1057_v39, %v1060_v54 }
 0x249   : > { %v1062_v56 = vmul.f32 1.442695, %v1061_v55  ;;  %v1780_v55 = vld [vmem:[%s2996_s15 + $0x38] sm:$0xff] }
 0x24b   : > { %2372 = vpow2.f32 %v1062_v56  ;;  %v1778_v56 = vld [vmem:[%s2996_s15 + $0x28] sm:$0xff] }
 0x258   : > { %v2373_v57 = vpop.eup %2372 }
 0x259   : > { %v1064_v58 = vsel %vm980_vm2, %v2373_v57, 0.0 }
 0x266   : > { %1065 = vadd.xlane.f32.xlu1 %v1064_v58  ;;  %v1776_v58 = vld [vmem:[%s2996_s15 + $0x18] sm:$0xff] }
 0x2ba   : > { %v1223_v59 = vpop.xlane.xlu1 %1222 }
 0x2bb   : > { %v1224_v60 = vsub.f32 %v1220_v43, %v1223_v59  ;;  %v1775_v59 = vld [vmem:[%s2996_s15 + $0x10] sm:$0xff] }
 0x2bd   : > { %v1225_v61 = vmul.f32 1.442695, %v1224_v60  ;;  %v1774_v60 = vld [vmem:[%s2996_s15 + $0x8] sm:$0xff] }
 0x2be   : > { %v1390_v62 = vpop.xlane.xlu0 %1389  ;;  %v1234_v12 = vpop.permute.xlu1 %1233 }
 0x2bf   : > { %2374 = vpow2.f32 %v1225_v61  ;;  %v1391_v63 = vsub.f32 %v1387_v47, %v1390_v62  ;;  %v1773_v61 = vld [vmem:[%s2996_s15] sm:$0xff]  ;;  %v1900_v62 = vld [vmem:[%s2998_s17 + $0xf8] sm:$0xff] }
 0x2c1   : > { %v1392_v0 = vmul.f32 1.442695, %v1391_v63  ;;  %v1884_v63 = vld [vmem:[%s2998_s17 + $0x78] sm:$0xff] }
 0x2c2   : > { %v1556_v2 = vpop.xlane.xlu0 %1555 }
 0x2c3   : > { %2376 = vpow2.f32 %v1392_v0  ;;  %v1557_v3 = vsub.f32 %v1553_v51, %v1556_v2  ;;  %v1899_v0 = vld [vmem:[%s2998_s17 + $0xf0] sm:$0xff] }
 0x2c4   : > { %v1883_v2 = vld [vmem:[%s2998_s17 + $0x70] sm:$0xff] }
 0x2c5   : > { %v1558_v4 = vmul.f32 1.442695, %v1557_v3  ;;  %v1898_v3 = vld [vmem:[%s2998_s17 + $0xe8] sm:$0xff] }
 0x2c7   : > { %2378 = vpow2.f32 %v1558_v4  ;;  %v1882_v4 = vld [vmem:[%s2998_s17 + $0x68] sm:$0xff] }
 0x2cc   : > { %v2375_v6 = vpop.eup %2374 }
 0x2cd   : > { %v1227_v7 = vsel %vm980_vm2, %v2375_v6, 0.0 }
 0x2ce   : > { %1228 = vadd.xlane.f32.xlu0 %v1227_v7  ;;  %v1881_v7 = vld [vmem:[%s2998_s17 + $0x60] sm:$0xff] }
 0x2d0   : > { %v2377_v8 = vpop.eup %2376 }
 0x2d1   : > { %v1394_v9 = vsel %vm980_vm2, %v2377_v8, 0.0 }
 0x2d2   : > { %1395 = vadd.xlane.f32.xlu1 %v1394_v9  ;;  %v1880_v9 = vld [vmem:[%s2998_s17 + $0x58] sm:$0xff] }
 0x2d4   : > { %v2379_v10 = vpop.eup %2378 }
 0x2d5   : > { %v1560_v11 = vsel %vm980_vm2, %v2379_v10, 0.0 }
 0x2d6   : > { %1561 = vadd.xlane.f32.xlu0 %v1560_v11  ;;  %v1879_v11 = vld [vmem:[%s2998_s17 + $0x50] sm:$0xff] }
 0x2e3   : > { %1565 = vrot.lane.b32.xlu1 %v2731_v30, %s2458_s22  ;;  %s2461_s22 = smov 24  }
 0x2ec   : > { %1399 = vrot.lane.b32.xlu0 %v2731_v30, %s2456_s2  ;;  %v1660_v30 = vld [vmem:[%s2992_s11 + $0x10] sm:$0xff]  ;;  %s2459_s2 = smov 8  }
 0x2ed   : > { %2317 = vmatpush3.msra.mxu0 %v1660_v30  ;;  %v2161_v30 = vld [vmem:[%s2995_s14] ss:$0 sm:$0xff] }
 0x2ee   : > { %2318 = vmatprep.subr.mxu0 %v2454_v1 }
 0x2ef   : > { %v1066_v13 = vpop.xlane.xlu1 %1065  ;;  %2319 = vmatpush3.msra.mxu0 %v1659_v31 }
 0x2f0   : > { %2380 = vrcp.f32 %v1066_v13  ;;  %2320 = vmatprep.subr.mxu0 %v2454_v1  ;;  %v1878_v13 = vld [vmem:[%s2998_s17 + $0x48] sm:$0xff] }
 0x2f1   : > { %2321 = vmatpush3.msra.mxu0 %v1658_v32 }
 0x2f2   : > { %2206 = vmatprep.subr.mxu0 %v1900_v62 }
 0x2fd   : > { %v2381_v14 = vpop.eup %2380 }
 0x2fe   : > { %v1068_v15 = vmul.f32 %v2381_v14, %v2373_v57  ;;  %v1777_v57 = vld [vmem:[%s2996_s15 + $0x20] sm:$0xff] }
 0x2ff   : > { %v1893_v14 = vld [vmem:[%s2998_s17 + $0xc0] sm:$0xff] }
 0x300   : > { %2282 = vmatmul.mubr.msk.f32.vlgmr.msra.gmra.mxu1 %vm980_vm2, %v1068_v15  ;;  %v1877_v15 = vld [vmem:[%s2998_s17 + $0x40] sm:$0xff] }
 0x301   : > { %2290 = vmatpush3.msra.mxu1 %v1234_v12  ;;  %2291 = vmatprep.mubr.msk.f32.mxu1 %vm2455_vm0, %v2454_v1  ;;  %v1894_v12 = vld [vmem:[%s2998_s17 + $0xc8] sm:$0xff] }
 0x302   : > { %2299 = vmatprep.subr.mxu1 %v2454_v1 }
 0x357   : > { %v1229_v16 = vpop.xlane.xlu0 %1228 }
 0x358   : > { %2382 = vrcp.f32 %v1229_v16  ;;  %v1892_v16 = vld [vmem:[%s2998_s17 + $0xb8] sm:$0xff] }
 0x35b   : > { %v1396_v17 = vpop.xlane.xlu1 %1395 }
 0x35c   : > { %2384 = vrcp.f32 %v1396_v17  ;;  %v1876_v17 = vld [vmem:[%s2998_s17 + $0x38] sm:$0xff] }
 0x35f   : > { %v1562_v18 = vpop.xlane.xlu0 %1561  ;;  %v1566_v24 = vpop.permute.xlu1 %1565 }
 0x360   : > { %2386 = vrcp.f32 %v1562_v18  ;;  %v1891_v18 = vld [vmem:[%s2998_s17 + $0xb0] sm:$0xff] }
 0x363   : > { %v1400_v21 = vpop.permute.xlu0 %1399 }
 0x365   : > { %v2383_v19 = vpop.eup %2382 }
 0x366   : > { %v1231_v20 = vmul.f32 %v2383_v19, %v2375_v6  ;;  %v1897_v6 = vld [vmem:[%s2998_s17 + $0xe0] sm:$0xff]  ;;  %v1875_v19 = vld [vmem:[%s2998_s17 + $0x30] sm:$0xff] }
 0x368   : > { %2292 = vmatmul.mubr.msk.f32.vlgmr.msra.gmra.mxu1 %vm980_vm2, %v1231_v20  ;;  %v1890_v20 = vld [vmem:[%s2998_s17 + $0xa8] sm:$0xff] }
 0x369   : > { %v2385_v22 = vpop.eup %2384  ;;  %2300 = vmatpush3.msra.mxu1 %v1400_v21  ;;  %2301 = vmatprep.mubr.msk.f32.mxu1 %vm2455_vm0, %v2454_v1  ;;  %v1874_v21 = vld [vmem:[%s2998_s17 + $0x28] sm:$0xff] }
 0x36a   : > { %2309 = vmatprep.subr.mxu1 %v2454_v1  ;;  %v1398_v23 = vmul.f32 %v2385_v22, %v2377_v8  ;;  %v1896_v8 = vld [vmem:[%s2998_s17 + $0xd8] sm:$0xff]  ;;  %v1889_v22 = vld [vmem:[%s2998_s17 + $0xa0] sm:$0xff] }
 0x36c   : > { %2302 = vmatmul.mubr.msk.f32.vlgmr.msra.gmra.mxu1 %vm980_vm2, %v1398_v23  ;;  %v1873_v23 = vld [vmem:[%s2998_s17 + $0x20] sm:$0xff] }
 0x36d   : > { %v2387_v25 = vpop.eup %2386  ;;  %2310 = vmatpush3.msra.mxu1 %v1566_v24  ;;  %2311 = vmatprep.mubr.msk.f32.mxu1 %vm2455_vm0, %v2454_v1 }
 0x36e   : > { %v1564_v26 = vmul.f32 %v2387_v25, %v2379_v10  ;;  %1820 = vmatprep.subr.mxu1 %v1780_v55  ;;  %v1895_v10 = vld [vmem:[%s2998_s17 + $0xd0] sm:$0xff] }
 0x370   : > { %2312 = vmatmul.mubr.msk.f32.vlgmr.msra.gmra.mxu1 %vm980_vm2, %v1564_v26 }
 0x371   : > { %1860 = vmatprep.mubr.f32.mxu1 %v2454_v1 }
 0x3c0   : > { %v1138_v27 = vpop.f32.mrf.mxu1 }
 0x3c2   : > { %v2283_v28 = vpop.f32.mrf.mxu1 }
 0x3c3   : > { %v2160_v28 = vld [vmem:[%s2994_s13] ss:$0 sm:$0xff] }
 0x428   : > { %v1305_v33 = vpop.f32.mrf.mxu1 }
 0x429   : > { %1642 = vrot.lane.b32.xlu1 %v1305_v33, %s2459_s2  ;;  %v1888_v33 = vld [vmem:[%s2998_s17 + $0x98] sm:$0xff]  ;;  %s3037_s2 = sld [smem:[#allocation19_spill]] }
 0x42a   : > { %v2293_v34 = vpop.f32.mrf.mxu1 }
 0x42b   : > { %v1872_v34 = vld [vmem:[%s2998_s17 + $0x18] sm:$0xff] }
 0x42c   : > { %v1471_v35 = vpop.f32.mrf.mxu1 }
 0x42d   : > { %1646 = vrot.lane.b32.xlu0 %v1471_v35, %s2460_s27  ;;  %v1887_v35 = vld [vmem:[%s2998_s17 + $0x90] sm:$0xff] }
 0x42e   : > { %v2303_v36 = vpop.f32.mrf.mxu1 }
 0x42f   : > { %v1871_v36 = vld [vmem:[%s2998_s17 + $0x10] sm:$0xff]  ;;  %s3038_s6 = smov %s3037_s2  ;;  %s2021_s27 = scalar_lea.hbm %s3037_s2, %s2167_s0 }
 0x430   : > { %v1637_v37 = vpop.f32.mrf.mxu1 }
 0x431   : > { %1650 = vrot.lane.b32.xlu1 %v1637_v37, %s2461_s22  ;;  %v1886_v37 = vld [vmem:[%s2998_s17 + $0x88] sm:$0xff]  ;;  %s697_s22 = sand.u32 1, %s2444_s25  }
 0x432   : > { %v2313_v38 = vpop.f32.mrf.mxu1  ;;  %s2134_s21 = sshll.u32 %s697_s22, 3  ;;  %s2010_s7 = scalar_lea.sflag [#allocation3], %s697_s22 }
 0x433   : > { %v1870_v38 = vld [vmem:[%s2998_s17 + $0x8] sm:$0xff]  ;;  %s699_s26 = scalar_lea.vmem [#allocation2], %s2134_s21 }
 0x434   : > { %s2023_s29 = sshll.u32 %s699_s26, 4  ;;  %s2024_s29 = int_to_ptr.vmem [resolvable:$true] %s2023_s29 }
 0x435   : > { %s2392_s1 = scalar_lea.vmem %s2024_s29, 128  ;;  %p2399_p0 = scmp.lt.s32.totalorder %s2024_s29, %s2397_s24 }
 0x436   : > { %p2393_p11 = scmp.ne.s32.totalorder %s2024_s29, %s2392_s1  ;;  %p2400_p1 = scmp.lt.s32.totalorder %s2398_s3, %s2392_s1 }
 0x438   : > { %p2394_p12 = pnand %p2393_p11, %p2611_p5  ;;  %p2401_p2 = por %p2400_p1, %p2399_p0 }
 0x43a   : > { %p2395_p13 = pneg %p2394_p12 }
 0x43c   : > { %p2402_p3 = pnand %p2401_p2, %p2395_p13 }
 0x49b   : > { %v1643_v39 = vpop.permute.xlu1 %1642 }
 0x49c   : > { %v1653_v40 = vsel %vm980_vm2, %v1138_v27, %v1643_v39  ;;  %v1885_v39 = vld [vmem:[%s2998_s17 + $0x80] sm:$0xff] }
 0x49f   : > { %v1647_v1 = vpop.permute.xlu0 %1646 }
 0x4a0   : > { %v1655_v41 = vsel %vm1654_vm3, %v1653_v40, %v1647_v1  ;;  %v1869_v1 = vld [vmem:[%s2998_s17] sm:$0xff]  ;;  %v1783_v40 = vlaneseq }
 0x4a3   : > { %v1651_v42 = vpop.permute.xlu1 %1650 }
 0x4a4   : > { %v1657_v43 = vsel %vm1656_vm4, %v1655_v41, %v1651_v42  ;;  %v1784_v41 = vshrl.u32 %v1783_v40, 7 }
 0x4a5   : > { %2323 = vmatmul.mubr.msk.f32.vlgmr.msra.gmra.mxu0 %vm738_vm1, %v1657_v43  ;;  %v1781_v43 = vld [vmem:[%s2997_s16] sm:$0x3] }
 0x4a6   : > { %2207 = vmatpush3.msra.mxu0 %v1884_v63  ;;  %v1785_v42 = vsub.s32 0, %v1784_v41 }
 0x4a7   : > { %2208 = vmatprep.subr.mxu0 %v1899_v0 }
 0x4a8   : > { %2209 = vmatpush3.msra.mxu0 %v1883_v2 }
 0x4a9   : > { %2210 = vmatprep.subr.mxu0 %v1898_v3 }
 0x4aa   : > { %2211 = vmatpush3.msra.mxu0 %v1882_v4 }
 0x4ab   : > { %2212 = vmatprep.subr.mxu0 %v1897_v6  ;;  %v2164_v6 = vld [vmem:[%s3000_s19] ss:$0 sm:$0xff] }
 0x4ac   : > { %2213 = vmatpush3.msra.mxu0 %v1881_v7 }
 0x4ad   : > { %2214 = vmatprep.subr.mxu0 %v1896_v8  ;;  %v2165_v8 = vld [vmem:[%s3001_s20] ss:$0 sm:$0xff] }
 0x4ae   : > { %2215 = vmatpush3.msra.mxu0 %v1880_v9 }
 0x4af   : > { %2216 = vmatprep.subr.mxu0 %v1895_v10 }
 0x4b0   : > { %2217 = vmatpush3.msra.mxu0 %v1879_v11 }
 0x4b1   : > { %2218 = vmatprep.subr.mxu0 %v1894_v12 }
 0x4b2   : > { %2219 = vmatpush3.msra.mxu0 %v1878_v13 }
 0x4b3   : > { %2220 = vmatprep.subr.mxu0 %v1893_v14 }
 0x4b4   : > { %2221 = vmatpush3.msra.mxu0 %v1877_v15 }
 0x4b5   : > { %2222 = vmatprep.subr.mxu0 %v1892_v16 }
 0x4b6   : > { %2223 = vmatpush3.msra.mxu0 %v1876_v17 }
 0x4b7   : > { %2224 = vmatprep.subr.mxu0 %v1891_v18 }
 0x4b8   : > { %2225 = vmatpush3.msra.mxu0 %v1875_v19 }
 0x4b9   : > { %2226 = vmatprep.subr.mxu0 %v1890_v20 }
 0x4ba   : > { %2227 = vmatpush3.msra.mxu0 %v1874_v21 }
 0x4bb   : > { %2228 = vmatprep.subr.mxu0 %v1889_v22 }
 0x4bc   : > { %2229 = vmatpush3.msra.mxu0 %v1873_v23 }
 0x4bd   : > { %2230 = vmatprep.subr.mxu0 %v1888_v33 }
 0x4be   : > { %2231 = vmatpush3.msra.mxu0 %v1872_v34 }
 0x4bf   : > { %2232 = vmatprep.subr.mxu0 %v1887_v35 }
 0x4c0   : > { %2233 = vmatpush3.msra.mxu0 %v1871_v36 }
 0x4c1   : > { %2234 = vmatprep.subr.mxu0 %v1886_v37 }
 0x4c2   : > { %2235 = vmatpush3.msra.mxu0 %v1870_v38 }
 0x4c3   : > { %2236 = vmatprep.subr.mxu0 %v1885_v39 }
 0x4c4   : > { %2237 = vmatpush3.msra.mxu0 %v1869_v1 }
 0x565   : > { %v1738_v45 = vpop.f32.mrf.mxu0 }
 0x566   : > { %v1739_v46 = vadd.f32 %v2158_v44, %v1738_v45  ;;  %v1789_v44 = vsub.s32 1, %v1784_v41  ;;  %v1786_v45 = vrot.slane %v1781_v43, %v1785_v42 }
 0x567   : > { %v2324_v47 = vpop.f32.mrf.mxu0 }
 0x568   : > { %v1742_v48 = vadd.f32 %v1739_v46, %v2653_v5  ;;  %v1779_v5 = vld [vmem:[%s2996_s15 + $0x30] sm:$0xff]  ;;  %v1790_v46 = vrot.slane %v1781_v43, %v1789_v44 }
 0x569   : > { %1821 = vmatpush1.msra.mxu1 %v1779_v5 }
 0x56a   : > { %v1743_v49 = vsel %vm738_vm1, %v1742_v48, 0.0  ;;  %1822 = vmatprep.subr.mxu1 %v1778_v56 }
 0x56b   : > { %1744 = vadd.xlane.f32.xlu0 %v1743_v49  ;;  %1823 = vmatpush1.msra.mxu1 %v1777_v57 }
 0x56c   : > { %1824 = vmatprep.subr.mxu1 %v1776_v58 }
 0x56d   : > { %1825 = vmatpush1.msra.mxu1 %v1775_v59 }
 0x56e   : > { %1826 = vmatprep.subr.mxu1 %v1774_v60 }
 0x56f   : > { %1827 = vmatpush1.msra.mxu1 %v1773_v61 }
 0x5f4   : > { %v1745_v50 = vpop.xlane.xlu0 %1744 }
 0x5f5   : > { %v1747_v51 = vmul.f32 0.03125, %v1745_v50 }
 0x5f7   : > { %v2799_v52 = vsub.f32 %v1742_v48, %v1747_v51 }
 0x5f9   : > { %v1749_v53 = vmul.f32 %v2799_v52, %v2799_v52 }
 0x5fb   : > { %v1750_v54 = vsel %vm738_vm1, %v1749_v53, 0.0 }
 0x5fc   : > { %1751 = vadd.xlane.f32.xlu1 %v1750_v54  ;;  %v2163_v54 = vld [vmem:[%s2999_s18] ss:$0 sm:$0xff] }
 0x685   : > { %v1752_v24 = vpop.xlane.xlu1 %1751 }
 0x686   : > { %v1753_v25 = vmul.f32 0.03125, %v1752_v24 }
 0x688   : > { %v1754_v26 = vadd.f32 1e-05, %v1753_v25 }
 0x68a   : > { %2388 = vrsqrt.f32 %v1754_v26 }
 0x697   : > { %v2389_v27 = vpop.eup %2388 }
 0x698   : > { %v1756_v29 = vmul.f32 %v2389_v27, %v2799_v52 }
 0x69a   : > { %v1764_v31 = vmul.f32 %v2160_v28, %v1756_v29 }
 0x69c   : > { %v1772_v32 = vadd.f32 %v2161_v30, %v1764_v31 }
 0x69e   : > { %2162 = vmatmul.mubr.msk.f32.vlgmr.msra.gmra.mxu1 %vm738_vm1, %v1772_v32 }
 0x75e   : > { %v1862_v47 = vpop.f32.mrf.mxu1 }
 0x75f   : > { %v1863_v48 = vadd.f32 %v1862_v47, %v1786_v45 }
 0x760   : > { %v1864_v49 = vpop.f32.mrf.mxu1 }
 0x761   : > { %v1865_v50 = vadd.f32 %v1864_v49, %v1790_v46  ;;  %v1867_v52 = vmax.f32 %v1863_v48, 0.0 }
 0x763   : > { %v1868_v51 = vmax.f32 %v1865_v50, 0.0 }
 0x765   : > { %1972 = vmatprep.mubr.f32.mxu0 %v1868_v51 }
 0x766   : > { %1973 = vmatmul.mubr.f32.vlgmr.msra.gmra.mxu0 %v1867_v52 }
 0x826   : > { %v2238_v53 = vpop.f32.mrf.mxu0 }
 0x828   : > { %v2239_v55 = vpop.f32.mrf.mxu0 }
 0x829   : > { %v2240_v5 = vadd.f32 %v2239_v55, %v2238_v53 }
 0x82b   : > { %v1975_v56 = vadd.f32 %v2240_v5, %v2163_v54 }
 0x82d   : > { %v1978_v57 = vadd.f32 %v1975_v56, %v1772_v32 }
 0x82f   : > { %v1979_v58 = vsel %vm738_vm1, %v1978_v57, 0.0 }
 0x830   : > { %1980 = vadd.xlane.f32.xlu0 %v1979_v58 }
 0x8b9   : > { %v1981_v59 = vpop.xlane.xlu0 %1980 }
 0x8ba   : > { %v1982_v60 = vmul.f32 0.03125, %v1981_v59 }
 0x8bc   : > { %v1983_v61 = vsub.f32 %v1978_v57, %v1982_v60 }
 0x8be   : > { %v1984_v62 = vmul.f32 %v1983_v61, %v1983_v61 }
 0x8c0   : > { %v1985_v63 = vsel %vm738_vm1, %v1984_v62, 0.0 }
 0x8c1   : > { %1986 = vadd.xlane.f32.xlu0 %v1985_v63 }
 0x94a   : > { %v1987_v0 = vpop.xlane.xlu0 %1986 }
 0x94b   : > { %v1988_v2 = vmul.f32 0.03125, %v1987_v0 }
 0x94d   : > { %v1989_v3 = vadd.f32 1e-05, %v1988_v2 }
 0x94f   : > { %2390 = vrsqrt.f32 %v1989_v3 }
 0x95c   : > { %v2391_v4 = vpop.eup %2390 }
 0x95d   : > { %v1991_v7 = vmul.f32 %v2391_v4, %v1983_v61 }
 0x95f   : > { %v1999_v9 = vmul.f32 %v2164_v6, %v1991_v7 }
 0x961   : > { %v2007_v10 = vadd.f32 %v2165_v8, %v1999_v9 }
 0x963   : > { %2008 = vst.msk [vmem:[%s699_s26] sm:$0xff] %vm738_vm1, %v2007_v10 }
 0x964   : > { %2405 = shalt.err (!%p2402_p3)
}
 0x965   : > { %s2406_s21 = scalar_lea.hbm %s2021_s27, 128  ;;  %s2410_s0 = scalar_lea.hbm %s3038_s6, 256 }
 0x966   : > { %p2407_p4 = scmp.ne.s32.totalorder %s2021_s27, %s2406_s21  ;;  %p2411_p9 = scmp.lt.s32.totalorder %s2021_s27, %s3038_s6 }
 0x967   : > { %p2412_p10 = scmp.lt.s32.totalorder %s2410_s0, %s2406_s21 }
 0x968   : > { %p2408_p7 = pnand %p2407_p4, %p2611_p5 }
 0x969   : > { %p2413_p11 = por %p2412_p10, %p2411_p9 }
 0x96a   : > { %p2409_p8 = pneg %p2408_p7 }
 0x96c   : > { %p2414_p12 = pnand %p2413_p11, %p2409_p8 }
 0x96e   : > { %2417 = shalt.err (!%p2414_p12)
}
 0x96f   : > { %2325 = dma.vmem_to_hbm [thread:$0]  (%p2611_p5), %s2024_s29, 128, %s2021_s27, %s2010_s7  }
 0x970 PF: > { %s3039_s28 = sld [smem:[#allocation7_spill]] }
 0x971   : > { %s3040_s2 = sld [smem:[#allocation5_spill]] }
 0x976   : > { %p2331_p13 = scmp.ge.s32.totalorder %s3039_s28, 2 }
 0x977   : > { %s2035_s4 = sand.u32 1, %s3040_s2  }
 0x978   : > { %p2328_p0 = pnand %p2331_p13, %p2615_p6  ;;  %s2036_s24 = scalar_lea.sflag [#allocation3], %s2035_s4 }
 0x97a   : > { %p2329_p1 = pneg %p2328_p0 }
 0x97c   : > { %2435 = dma.done.wait (%p2329_p1), %s2036_s24, 128  }
 0x97d   : > { %2437 = vsyncadd (%p2329_p1), %s2036_s24, 4294967168  ;;  %s3042_s27 = sld [smem:[#allocation8_spill]]  ;;  %s3045_s2 = smov %s2444_s25 }
 0x97e   : > { %s3043_s3 = sld [smem:[#allocation6_spill]] }
 0x97f   : > { %s3044_s26 = sld [smem:[#allocation9_spill]] }
 0x983   : > { %p31_p2 = scmp.ge.s32.totalorder %s3042_s27, 4  }
 0x984   : > { %s3046_s25 = smov %s3043_s3 }
 0x985   :  { %33 = sbr.rel (!%p31_p2) target bundleno = 13 (0xd), region = 151 }
 0x98a   :  { %2041 = vsyncpa [#allocation3], 1 }
 0x98b   :  { %2043 = vsyncpa [#allocation3 + $0x1], 1 }

</bundles_post_ra>
